<compile_context>
chip_gen: v5e
topology: v5e:2x2
jax: 0.10.0
libtpu: 0.0.40
codegen_flags: <defaults>
</compile_context>

<pallas_src>
import jax
import jax.numpy as jnp
from jax.experimental import pallas as pl
from jax.experimental.pallas import tpu as pltpu


# ---------------------------------------------------------------------------
# Kernel factory: one grid step = BB point clouds (BB*N input rows).
# ---------------------------------------------------------------------------
def _make_kernel(BB, N, latent_size, p2):
    def kernel(x_ref, w1_ref, w2_ref, w3_ref, wd1_ref, wd2_ref, wd3_ref,
               b_ref, out_ref):
        pts = x_ref[...]                                        # (BB*N, 2) f32

        # ---- encoder layer 1 (in_channels=2): VPU broadcast-MAC ----------
        w1 = w1_ref[...]                                        # (2, 64)
        h = (pts[:, 0:1] * w1[0:1, :]
             + pts[:, 1:2] * w1[1:2, :]
             + b_ref[0:1, 0:64])                                # (BB*N, 64)
        h = jnp.maximum(h, 0.0)

        def mm(a, w_ref):
            # Cast activations to the (possibly bf16) weight dtype; keep f32
            # accumulation on the MXU.
            return jnp.dot(a.astype(w_ref.dtype), w_ref[...],
                           preferred_element_type=jnp.float32)

        # ---- encoder layers 2/3: batched over all BB*N points (MXU) ------
        h = jnp.maximum(mm(h, w2_ref) + b_ref[1:2, 0:128], 0.0)  # (BB*N, 128)
        h = mm(h, w3_ref) + b_ref[2:3, 0:latent_size]            # (BB*N, L)

        # ---- global max-pool over the point axis (per cloud) -------------
        # (BB*N, L) -> (BB, N, L): pure leading-dim split, no lane relayout;
        # sublane (XLU) reduction over N.
        z = jnp.max(h.reshape(BB, N, latent_size), axis=1)       # (BB, L)

        # ---- decoder: batched over the BB clouds (M=BB, not M=1) ---------
        d = jnp.maximum(mm(z, wd1_ref) + b_ref[3:4, 0:256], 0.0)  # (BB, 256)
        d = jnp.maximum(mm(d, wd2_ref) + b_ref[4:5, 0:256], 0.0)  # (BB, 256)
        out_ref[...] = mm(d, wd3_ref) + b_ref[5:6, 0:p2]          # (BB, P2)

    return kernel


def _pick_block_batch(B, N, target_rows=512):
    """Pick how many clouds to fuse per grid step.

    Keep every block shape either 8-aligned or full-dim, and aim for an
    encoder M-dimension (BB*N) of a few hundred rows so the MXU sublanes are
    well utilised without blowing up VMEM.
    """
    cands = [bb for bb in range(1, B + 1)
             if B % bb == 0 and (bb == B or (bb % 8 == 0 and (bb * N) % 8 == 0))]
    for bb in cands:
        if bb * N >= target_rows:
            return bb
    return cands[-1]          # small problems: fuse the whole batch


# ---------------------------------------------------------------------------
# Parameter construction (deterministic, PyTorch-like default init shapes).
# ---------------------------------------------------------------------------
def init_params(key, point_size, latent_size):
    def uni(k, shape, fan_in):
        bound = 1.0 / jnp.sqrt(float(fan_in))
        return jax.random.uniform(k, shape, jnp.float32, -bound, bound)

    ks = jax.random.split(key, 20)
    p = {}
    # Conv1d(k=1) weights stored as (out, in)
    p["conv1_w"] = uni(ks[0], (64, 2), 2);        p["conv1_b"] = uni(ks[1], (64,), 2)
    p["conv2_w"] = uni(ks[2], (128, 64), 64);     p["conv2_b"] = uni(ks[3], (128,), 64)
    p["conv3_w"] = uni(ks[4], (latent_size, 128), 128)
    p["conv3_b"] = uni(ks[5], (latent_size,), 128)
    # BatchNorm1d params + running stats (eval mode)
    for i, c in zip((1, 2, 3), (64, 128, latent_size)):
        p[f"bn{i}_gamma"] = 1.0 + 0.1 * jax.random.normal(ks[5 + i], (c,), jnp.float32)
        p[f"bn{i}_beta"] = 0.1 * jax.random.normal(ks[8 + i], (c,), jnp.float32)
        p[f"bn{i}_mean"] = 0.05 * jax.random.normal(ks[11 + i], (c,), jnp.float32)
        p[f"bn{i}_var"] = 1.0 + 0.1 * jax.random.uniform(ks[14 + i], (c,), jnp.float32)
    # Linear layers: weight (out, in), bias (out,)
    p["dec1_w"] = uni(ks[18], (256, latent_size), latent_size)
    p["dec1_b"] = uni(ks[19], (256,), latent_size)
    k2 = jax.random.split(ks[19], 4)
    p["dec2_w"] = uni(k2[0], (256, 256), 256);    p["dec2_b"] = uni(k2[1], (256,), 256)
    p["dec3_w"] = uni(k2[2], (point_size * 2, 256), 256)
    p["dec3_b"] = uni(k2[3], (point_size * 2,), 256)
    return p


def _fold_bn(conv_w, conv_b, gamma, beta, mean, var, eps=1e-5):
    """Fold eval-mode BN into a 1x1 conv.  Returns (W_in_out, b) for x @ W + b."""
    s = gamma / jnp.sqrt(var + eps)                       # (out,)
    w_eff = conv_w.T * s[None, :]                         # (in, out)
    b_eff = conv_b * s + (beta - mean * s)                # (out,)
    return w_eff.astype(jnp.float32), b_eff.astype(jnp.float32)


# ---------------------------------------------------------------------------
# Wrapper: layout plumbing + BN folding + pallas_call.
# ---------------------------------------------------------------------------
def pointcloud_ae_forward(x_ncl, params, point_size, latent_size,
                          matmul_dtype=jnp.float32):
    B, c_in, N = x_ncl.shape
    assert c_in == 2
    p2 = point_size * 2

    # Channels-last, flattened over (batch, point): the kernel sees plain
    # row-major matmul operands with M = BB*N.
    x_flat = jnp.transpose(x_ncl, (0, 2, 1)).reshape(B * N, 2).astype(jnp.float32)

    w1, b1 = _fold_bn(params["conv1_w"], params["conv1_b"],
                      params["bn1_gamma"], params["bn1_beta"],
                      params["bn1_mean"], params["bn1_var"])
    w2, b2 = _fold_bn(params["conv2_w"], params["conv2_b"],
                      params["bn2_gamma"], params["bn2_beta"],
                      params["bn2_mean"], params["bn2_var"])
    w3, b3 = _fold_bn(params["conv3_w"], params["conv3_b"],
                      params["bn3_gamma"], params["bn3_beta"],
                      params["bn3_mean"], params["bn3_var"])
    wd1, bd1 = params["dec1_w"].T.astype(jnp.float32), params["dec1_b"].astype(jnp.float32)
    wd2, bd2 = params["dec2_w"].T.astype(jnp.float32), params["dec2_b"].astype(jnp.float32)
    wd3, bd3 = params["dec3_w"].T.astype(jnp.float32), params["dec3_b"].astype(jnp.float32)

    # MXU-bound weights may be bf16 (v6e/v7x native path); layer-1 / biases /
    # relu / max stay in f32 (v5e VPU has no bf16 path, and accumulation is f32).
    w2m, w3m = w2.astype(matmul_dtype), w3.astype(matmul_dtype)
    wd1m, wd2m, wd3m = (wd1.astype(matmul_dtype), wd2.astype(matmul_dtype),
                        wd3.astype(matmul_dtype))

    # Pack the six bias rows into one (8, Cmax) tile: one DMA / one buffer.
    widths = (64, 128, latent_size, 256, 256, p2)
    cmax = max(widths)
    bias_pack = jnp.zeros((8, cmax), jnp.float32)
    for i, (b, w) in enumerate(zip((b1, b2, b3, bd1, bd2, bd3), widths)):
        bias_pack = bias_pack.at[i, :w].set(b)

    BB = _pick_block_batch(B, N)
    grid = (B // BB,)
    kernel = _make_kernel(BB, N, latent_size, p2)

    def full(arr):
        # Constant index_map -> weight tile stays resident across grid steps.
        return pl.BlockSpec(arr.shape, lambda i: (0, 0))

    in_specs = [pl.BlockSpec((BB * N, 2), lambda i: (i, 0)),
                full(w1), full(w2m), full(w3m),
                full(wd1m), full(wd2m), full(wd3m),
                full(bias_pack)]

    out = pl.pallas_call(
        kernel,
        out_shape=jax.ShapeDtypeStruct((B, p2), jnp.float32),
        grid=grid,
        in_specs=in_specs,
        out_specs=pl.BlockSpec((BB, p2), lambda i: (i, 0)),
        compiler_params=pltpu.CompilerParams(
            dimension_semantics=("parallel",)),
    )(x_flat, w1, w2m, w3m, wd1m, wd2m, wd3m, bias_pack)

    return out.reshape(B, point_size, 2)


# ---------------------------------------------------------------------------
# Pure-JAX reference (same math, applied directly from raw params).
# ---------------------------------------------------------------------------
def reference_forward(x_ncl, params, point_size, latent_size, eps=1e-5):
    x = jnp.transpose(x_ncl, (0, 2, 1)).astype(jnp.float32)  # (B, N, 2)

    def bn(h, i):
        s = params[f"bn{i}_gamma"] / jnp.sqrt(params[f"bn{i}_var"] + eps)
        return (h - params[f"bn{i}_mean"]) * s + params[f"bn{i}_beta"]

    h = jax.nn.relu(bn(x @ params["conv1_w"].T + params["conv1_b"], 1))
    h = jax.nn.relu(bn(h @ params["conv2_w"].T + params["conv2_b"], 2))
    h = bn(h @ params["conv3_w"].T + params["conv3_b"], 3)
    z = jnp.max(h, axis=1)                                    # (B, L)
    d = jax.nn.relu(z @ params["dec1_w"].T + params["dec1_b"])
    d = jax.nn.relu(d @ params["dec2_w"].T + params["dec2_b"])
    d = d @ params["dec3_w"].T + params["dec3_b"]
    return d.reshape(-1, point_size, 2)


if __name__ == "__main__":
    point_size = 16      # number of output points
    latent_size = 32
    B, N = 2, 16         # batch, input points per cloud

    key = jax.random.PRNGKey(0)
    k_x, k_p = jax.random.split(key)
    x = jax.random.normal(k_x, (B, 2, N), jnp.float32)   # PyTorch NCL input
    params = init_params(k_p, point_size, latent_size)

    ref = reference_forward(x, params, point_size, latent_size)

    # exact-ish f32 path (tight check)
    out = jax.block_until_ready(
        pointcloud_ae_forward(x, params, point_size, latent_size))
    assert out.shape == (B, point_size, 2), out.shape
    assert jnp.allclose(out, ref, rtol=1e-3, atol=1e-3), \
        float(jnp.max(jnp.abs(out - ref)))

    # bf16-MXU path (v6e/v7x throughput mode), looser tolerance
    out_bf16 = jax.block_until_ready(
        pointcloud_ae_forward(x, params, point_size, latent_size,
                              matmul_dtype=jnp.bfloat16))
    assert jnp.allclose(out_bf16, ref, rtol=5e-2, atol=5e-2), \
        float(jnp.max(jnp.abs(out_bf16 - ref)))

    print("KERNEL_OK")
</pallas_src>

<mosaic_0001>
module attributes {stable_mosaic.version = 11 : i64} {
  func.func @kernel(%arg0: i32, %arg1: memref<32x2xf32, #tpu.memory_space<vmem>>, %arg2: memref<2x64xf32, #tpu.memory_space<vmem>>, %arg3: memref<64x128xf32, #tpu.memory_space<vmem>>, %arg4: memref<128x32xf32, #tpu.memory_space<vmem>>, %arg5: memref<32x256xf32, #tpu.memory_space<vmem>>, %arg6: memref<256x256xf32, #tpu.memory_space<vmem>>, %arg7: memref<256x32xf32, #tpu.memory_space<vmem>>, %arg8: memref<8x256xf32, #tpu.memory_space<vmem>>, %arg9: memref<2x32xf32, #tpu.memory_space<vmem>>) attributes {dimension_semantics = [#tpu.dimension_semantics<parallel>], iteration_bounds = array<i64: 1>, scalar_prefetch = 0 : i64, scratch_operands = 0 : i64, tpu.core_type = #tpu.core_type<tc>, window_params = [{transform_indices = @transform_0, window_bounds = array<i64: 32, 2>}, {pipeline_mode = #tpu.pipeline_mode<synchronous>, transform_indices = @transform_1, window_bounds = array<i64: 2, 64>}, {pipeline_mode = #tpu.pipeline_mode<synchronous>, transform_indices = @transform_2, window_bounds = array<i64: 64, 128>}, {pipeline_mode = #tpu.pipeline_mode<synchronous>, transform_indices = @transform_3, window_bounds = array<i64: 128, 32>}, {pipeline_mode = #tpu.pipeline_mode<synchronous>, transform_indices = @transform_4, window_bounds = array<i64: 32, 256>}, {pipeline_mode = #tpu.pipeline_mode<synchronous>, transform_indices = @transform_5, window_bounds = array<i64: 256, 256>}, {pipeline_mode = #tpu.pipeline_mode<synchronous>, transform_indices = @transform_6, window_bounds = array<i64: 256, 32>}, {pipeline_mode = #tpu.pipeline_mode<synchronous>, transform_indices = @transform_7, window_bounds = array<i64: 8, 256>}, {transform_indices = @transform_8, window_bounds = array<i64: 2, 32>}]} {
    %c0 = arith.constant 0 : index
    %c0_0 = arith.constant 0 : index
    %0 = vector.load %arg1[%c0, %c0_0] : memref<32x2xf32, #tpu.memory_space<vmem>>, vector<32x2xf32>
    %c0_1 = arith.constant 0 : index
    %c0_2 = arith.constant 0 : index
    %1 = vector.load %arg2[%c0_1, %c0_2] : memref<2x64xf32, #tpu.memory_space<vmem>>, vector<2x64xf32>
    %2 = vector.extract_strided_slice %0 {offsets = [0, 0], sizes = [32, 1], strides = [1, 1]} : vector<32x2xf32> to vector<32x1xf32>
    %3 = vector.extract_strided_slice %1 {offsets = [0, 0], sizes = [1, 64], strides = [1, 1]} : vector<2x64xf32> to vector<1x64xf32>
    %4 = vector.broadcast %2 : vector<32x1xf32> to vector<32x64xf32>
    %5 = vector.broadcast %3 : vector<1x64xf32> to vector<32x64xf32>
    %6 = arith.mulf %4, %5 : vector<32x64xf32>
    %7 = vector.extract_strided_slice %0 {offsets = [0, 1], sizes = [32, 1], strides = [1, 1]} : vector<32x2xf32> to vector<32x1xf32>
    %8 = vector.extract_strided_slice %1 {offsets = [1, 0], sizes = [1, 64], strides = [1, 1]} : vector<2x64xf32> to vector<1x64xf32>
    %9 = vector.broadcast %7 : vector<32x1xf32> to vector<32x64xf32>
    %10 = vector.broadcast %8 : vector<1x64xf32> to vector<32x64xf32>
    %11 = arith.mulf %9, %10 : vector<32x64xf32>
    %12 = arith.addf %6, %11 : vector<32x64xf32>
    %c0_3 = arith.constant 0 : index
    %c0_4 = arith.constant 0 : index
    %13 = vector.load %arg8[%c0_3, %c0_4] : memref<8x256xf32, #tpu.memory_space<vmem>>, vector<1x64xf32>
    %14 = vector.broadcast %13 : vector<1x64xf32> to vector<32x64xf32>
    %15 = arith.addf %12, %14 : vector<32x64xf32>
    %cst = arith.constant 0.000000e+00 : f32
    %16 = vector.broadcast %cst : f32 to vector<32x64xf32>
    %17 = arith.maximumf %15, %16 : vector<32x64xf32>
    %c0_5 = arith.constant 0 : index
    %c0_6 = arith.constant 0 : index
    %18 = vector.load %arg3[%c0_5, %c0_6] : memref<64x128xf32, #tpu.memory_space<vmem>>, vector<64x128xf32>
    %cst_7 = arith.constant dense<0.000000e+00> : vector<32x128xf32>
    %19 = tpu.matmul %17, %18, %cst_7 {dimension_numbers = #tpu.dot_dimension_numbers<[1], [0], [0], [1], [0, 0, 1, 1], [], []>} : vector<32x64xf32>, vector<64x128xf32>, vector<32x128xf32> -> vector<32x128xf32>
    %c1 = arith.constant 1 : index
    %c0_8 = arith.constant 0 : index
    %20 = vector.load %arg8[%c1, %c0_8] : memref<8x256xf32, #tpu.memory_space<vmem>>, vector<1x128xf32>
    %21 = vector.broadcast %20 : vector<1x128xf32> to vector<32x128xf32>
    %22 = arith.addf %19, %21 : vector<32x128xf32>
    %cst_9 = arith.constant 0.000000e+00 : f32
    %23 = vector.broadcast %cst_9 : f32 to vector<32x128xf32>
    %24 = arith.maximumf %22, %23 : vector<32x128xf32>
    %c0_10 = arith.constant 0 : index
    %c0_11 = arith.constant 0 : index
    %25 = vector.load %arg4[%c0_10, %c0_11] : memref<128x32xf32, #tpu.memory_space<vmem>>, vector<128x32xf32>
    %cst_12 = arith.constant dense<0.000000e+00> : vector<32x32xf32>
    %26 = tpu.matmul %24, %25, %cst_12 {dimension_numbers = #tpu.dot_dimension_numbers<[1], [0], [0], [1], [0, 0, 1, 1], [], []>} : vector<32x128xf32>, vector<128x32xf32>, vector<32x32xf32> -> vector<32x32xf32>
    %c2 = arith.constant 2 : index
    %c0_13 = arith.constant 0 : index
    %27 = vector.load %arg8[%c2, %c0_13] : memref<8x256xf32, #tpu.memory_space<vmem>>, vector<1x32xf32>
    %28 = vector.broadcast %27 : vector<1x32xf32> to vector<32x32xf32>
    %29 = arith.addf %26, %28 : vector<32x32xf32>
    %30 = vector.shape_cast %29 : vector<32x32xf32> to vector<2x16x32xf32>
    %cst_14 = arith.constant dense<0xFF800000> : vector<2x32xf32>
    %31 = vector.multi_reduction <maximumf>, %30, %cst_14 [1] : vector<2x16x32xf32> to vector<2x32xf32>
    %c0_15 = arith.constant 0 : index
    %c0_16 = arith.constant 0 : index
    %32 = vector.load %arg5[%c0_15, %c0_16] : memref<32x256xf32, #tpu.memory_space<vmem>>, vector<32x256xf32>
    %cst_17 = arith.constant dense<0.000000e+00> : vector<2x256xf32>
    %33 = tpu.matmul %31, %32, %cst_17 {dimension_numbers = #tpu.dot_dimension_numbers<[1], [0], [0], [1], [0, 0, 1, 1], [], []>} : vector<2x32xf32>, vector<32x256xf32>, vector<2x256xf32> -> vector<2x256xf32>
    %c3 = arith.constant 3 : index
    %c0_18 = arith.constant 0 : index
    %34 = vector.load %arg8[%c3, %c0_18] : memref<8x256xf32, #tpu.memory_space<vmem>>, vector<1x256xf32>
    %35 = vector.broadcast %34 : vector<1x256xf32> to vector<2x256xf32>
    %36 = arith.addf %33, %35 : vector<2x256xf32>
    %cst_19 = arith.constant 0.000000e+00 : f32
    %37 = vector.broadcast %cst_19 : f32 to vector<2x256xf32>
    %38 = arith.maximumf %36, %37 : vector<2x256xf32>
    %c0_20 = arith.constant 0 : index
    %c0_21 = arith.constant 0 : index
    %39 = vector.load %arg6[%c0_20, %c0_21] : memref<256x256xf32, #tpu.memory_space<vmem>>, vector<256x256xf32>
    %cst_22 = arith.constant dense<0.000000e+00> : vector<2x256xf32>
    %40 = tpu.matmul %38, %39, %cst_22 {dimension_numbers = #tpu.dot_dimension_numbers<[1], [0], [0], [1], [0, 0, 1, 1], [], []>} : vector<2x256xf32>, vector<256x256xf32>, vector<2x256xf32> -> vector<2x256xf32>
    %c4 = arith.constant 4 : index
    %c0_23 = arith.constant 0 : index
    %41 = vector.load %arg8[%c4, %c0_23] : memref<8x256xf32, #tpu.memory_space<vmem>>, vector<1x256xf32>
    %42 = vector.broadcast %41 : vector<1x256xf32> to vector<2x256xf32>
    %43 = arith.addf %40, %42 : vector<2x256xf32>
    %cst_24 = arith.constant 0.000000e+00 : f32
    %44 = vector.broadcast %cst_24 : f32 to vector<2x256xf32>
    %45 = arith.maximumf %43, %44 : vector<2x256xf32>
    %c0_25 = arith.constant 0 : index
    %c0_26 = arith.constant 0 : index
    %46 = vector.load %arg7[%c0_25, %c0_26] : memref<256x32xf32, #tpu.memory_space<vmem>>, vector<256x32xf32>
    %cst_27 = arith.constant dense<0.000000e+00> : vector<2x32xf32>
    %47 = tpu.matmul %45, %46, %cst_27 {dimension_numbers = #tpu.dot_dimension_numbers<[1], [0], [0], [1], [0, 0, 1, 1], [], []>} : vector<2x256xf32>, vector<256x32xf32>, vector<2x32xf32> -> vector<2x32xf32>
    %c5 = arith.constant 5 : index
    %c0_28 = arith.constant 0 : index
    %48 = vector.load %arg8[%c5, %c0_28] : memref<8x256xf32, #tpu.memory_space<vmem>>, vector<1x32xf32>
    %49 = vector.broadcast %48 : vector<1x32xf32> to vector<2x32xf32>
    %50 = arith.addf %47, %49 : vector<2x32xf32>
    %c0_29 = arith.constant 0 : index
    %c0_30 = arith.constant 0 : index
    %51 = vector.load %arg9[%c0_29, %c0_30] : memref<2x32xf32, #tpu.memory_space<vmem>>, vector<2x32xf32>
    tpu.vector_store %arg9[%c0_29, %c0_30], %50 {strides = array<i32>} : memref<2x32xf32, #tpu.memory_space<vmem>>, vector<2x32xf32>,
    return
  }
  func.func @transform_0(%arg0: i32) -> (i32, i32) {
    %c0_i32 = arith.constant 0 : i32
    %c0_i32_0 = arith.constant 0 : i32
    return %arg0, %c0_i32 : i32, i32
  }
  func.func @transform_1(%arg0: i32) -> (i32, i32) {
    %c0_i32 = arith.constant 0 : i32
    %c0_i32_0 = arith.constant 0 : i32
    %c0_i32_1 = arith.constant 0 : i32
    return %c0_i32, %c0_i32_0 : i32, i32
  }
  func.func @transform_2(%arg0: i32) -> (i32, i32) {
    %c0_i32 = arith.constant 0 : i32
    %c0_i32_0 = arith.constant 0 : i32
    %c0_i32_1 = arith.constant 0 : i32
    return %c0_i32, %c0_i32_0 : i32, i32
  }
  func.func @transform_3(%arg0: i32) -> (i32, i32) {
    %c0_i32 = arith.constant 0 : i32
    %c0_i32_0 = arith.constant 0 : i32
    %c0_i32_1 = arith.constant 0 : i32
    return %c0_i32, %c0_i32_0 : i32, i32
  }
  func.func @transform_4(%arg0: i32) -> (i32, i32) {
    %c0_i32 = arith.constant 0 : i32
    %c0_i32_0 = arith.constant 0 : i32
    %c0_i32_1 = arith.constant 0 : i32
    return %c0_i32, %c0_i32_0 : i32, i32
  }
  func.func @transform_5(%arg0: i32) -> (i32, i32) {
    %c0_i32 = arith.constant 0 : i32
    %c0_i32_0 = arith.constant 0 : i32
    %c0_i32_1 = arith.constant 0 : i32
    return %c0_i32, %c0_i32_0 : i32, i32
  }
  func.func @transform_6(%arg0: i32) -> (i32, i32) {
    %c0_i32 = arith.constant 0 : i32
    %c0_i32_0 = arith.constant 0 : i32
    %c0_i32_1 = arith.constant 0 : i32
    return %c0_i32, %c0_i32_0 : i32, i32
  }
  func.func @transform_7(%arg0: i32) -> (i32, i32) {
    %c0_i32 = arith.constant 0 : i32
    %c0_i32_0 = arith.constant 0 : i32
    %c0_i32_1 = arith.constant 0 : i32
    return %c0_i32, %c0_i32_0 : i32, i32
  }
  func.func @transform_8(%arg0: i32) -> (i32, i32) {
    %c0_i32 = arith.constant 0 : i32
    %c0_i32_0 = arith.constant 0 : i32
    return %arg0, %c0_i32 : i32, i32
  }
}

</mosaic_0001>

<bundles_post_ra>
// kernel: tpu_custom_call.1
= control target key start
LH: loop header
LB: loop body
LE: loop exit
PB: predicated region body
PF: predicated region fallthrough
CT: control target
= control target key end

     0   :  { %13 = vsyncpa [#allocation3], 0  ;;  %s909_s0 = inlined_call_operand.vmem [shape: f32[32,2], index: 0, kind: input, shape index: {}]   ;;  %s910_s1 = inlined_call_operand.vmem [shape: f32[2,64], index: 1, kind: input, shape index: {}]   ;;  %s911_s2 = inlined_call_operand.vmem [shape: f32[64,128], index: 2, kind: input, shape index: {}]   ;;  %s912_s3 = inlined_call_operand.vmem [shape: f32[128,32], index: 3, kind: input, shape index: {}]   ;;  %s913_s4 = inlined_call_operand.vmem [shape: f32[32,256], index: 4, kind: input, shape index: {}]   ;;  %s914_s5 = inlined_call_operand.hbm [shape: f32[256,256], index: 5, kind: input, shape index: {}]   ;;  %s915_s6 = inlined_call_operand.vmem [shape: f32[256,32], index: 6, kind: input, shape index: {}]   ;;  %s916_s7 = inlined_call_operand.vmem [shape: f32[8,256], index: 7, kind: input, shape index: {}]   ;;  %s917_s8 = inlined_call_operand.hbm [shape: f32[2,32], index: 8, kind: output, shape index: {}]  }
   0x1   :  { %14 = vsyncpa [#allocation4], 0  ;;  %s29_s29 = sshll.u32 %s914_s5, 4  ;;  %s611_s30 = smov [#allocation2]   ;;  %s30_s29 = int_to_ptr.hbm [resolvable:$true] %s29_s29 }
   0x2   :  { %s31_s9 = sshll.u32 %s611_s30, 4  ;;  %s612_s10 = smov 256   ;;  %s32_s9 = int_to_ptr.vmem [resolvable:$true] %s31_s9 }
   0x3   :  { %s613_s11 = smov 16  }
   0x4   :  { %37 = dma.hbm_to_vmem [thread:$0]  %s30_s29, 8192, %s32_s9, [#allocation3], %s612_s10, %s612_s10, %s613_s11  }
   0x5   :  { %607 = dma.done.wait [#allocation3], 8192  }
   0x6   :  { %608 = vsyncadd [#allocation3], 4294959104  ;;  %v614_v0 = vmov 0   ;;  %v47_v1 = vld [vmem:[%s909_s0 + $0x8] sm:$0xff]  ;;  %v46_v2 = vld [vmem:[%s909_s0] sm:$0xff]  ;;  %v615_v4 = vmov 1  }
   0x7   :  { %554 = vset.pattern.permute.xlu1 %v614_v0  ;;  %552 = vset.pattern.permute.xlu0 %v614_v0  ;;  %v48_v3 = vld [vmem:[%s909_s0 + $0x10] sm:$0xff]  ;;  %v49_v5 = vld [vmem:[%s909_s0 + $0x18] sm:$0xff]  ;;  %v115_v8 = vld [vmem:[%s911_s2 + $0x28] sm:$0xff]  ;;  %vm119_vm0 = vcmask 523264   ;;  %vm211_vm1 = vcmask 261120   ;;  %vm247_vm2 = vcmask 1041409  }
   0x8   :  { %556 = vset.pattern.permute.xlu2 %v614_v0  ;;  %58 = vperm.xlu1 %554, %v47_v1   ;;  %v117_v6 = vld [vmem:[%s911_s2 + $0x38] sm:$0xff]  ;;  %v116_v7 = vld [vmem:[%s911_s2 + $0x30] sm:$0xff]  ;;  %v114_v9 = vld [vmem:[%s911_s2 + $0x20] sm:$0xff]  ;;  %s616_s23 = smov [#allocation5]   ;;  %s528_s0 = sshll.u32 %s917_s8, 4  ;;  %vm519_vm3 = vcmask 254976   ;;  %s529_s0 = int_to_ptr.hbm [resolvable:$true] %s528_s0 }
   0x9   :  { %53 = vperm.xlu0 %552, %v46_v2   ;;  %63 = vperm.xlu2 %556, %v48_v3   ;;  %v113_v10 = vld [vmem:[%s911_s2 + $0x18] sm:$0xff]  ;;  %v112_v11 = vld [vmem:[%s911_s2 + $0x10] sm:$0xff]  ;;  %v111_v12 = vld [vmem:[%s911_s2 + $0x8] sm:$0xff]  ;;  %s526_s24 = sshll.u32 %s616_s23, 4  ;;  %s527_s24 = int_to_ptr.vmem [resolvable:$true] %s526_s24 }
   0xa   :  { %140 = vmatpush.msra.mxu0 %v117_v6  ;;  %v110_v13 = vld [vmem:[%s911_s2] sm:$0xff]  ;;  %v180_v24 = vld [vmem:[%s912_s3 + $0x78] sm:$0xff]  ;;  %v179_v25 = vld [vmem:[%s912_s3 + $0x70] sm:$0xff] }
   0xb   :  { %v50_v16 = vld [vmem:[%s910_s1] sm:$0x3]  ;;  %182 = vmatpush.msra.mxu1 %v180_v24  ;;  %v178_v30 = vld [vmem:[%s912_s3 + $0x68] sm:$0xff]  ;;  %v176_v36 = vld [vmem:[%s912_s3 + $0x58] sm:$0xff] }
   0xc   :  { %141 = vmatpush.msra.mxu0 %v116_v7  ;;  %v71_v18 = vperm.slane %v50_v16, 0  ;;  %v92_v19 = vperm.slane %v50_v16, 1  ;;  %v101_v26 = vld [vmem:[%s916_s7] ss:$0 sm:$0xff]  ;;  %v175_v37 = vld [vmem:[%s912_s3 + $0x50] sm:$0xff]  ;;  %v174_v41 = vld [vmem:[%s912_s3 + $0x48] sm:$0xff] }
   0xd   :  { %183 = vmatpush.msra.mxu1 %v179_v25  ;;  %v177_v32 = vld [vmem:[%s912_s3 + $0x60] sm:$0xff]  ;;  %v172_v45 = vld [vmem:[%s912_s3 + $0x38] sm:$0xff]  ;;  %v171_v48 = vld [vmem:[%s912_s3 + $0x30] sm:$0xff] }
   0xe   :  { %142 = vmatpush.msra.mxu0 %v115_v8  ;;  %v173_v42 = vld [vmem:[%s912_s3 + $0x40] sm:$0xff]  ;;  %v170_v52 = vld [vmem:[%s912_s3 + $0x28] sm:$0xff]  ;;  %v168_v56 = vld [vmem:[%s912_s3 + $0x18] sm:$0xff] }
   0xf   :  { %184 = vmatpush.msra.mxu1 %v178_v30  ;;  %v169_v53 = vld [vmem:[%s912_s3 + $0x20] sm:$0xff]  ;;  %v167_v59 = vld [vmem:[%s912_s3 + $0x10] sm:$0xff]  ;;  %v166_v60 = vld [vmem:[%s912_s3 + $0x8] sm:$0xff] }
  0x10   :  { %555 = vset.pattern.permute.xlu1 %v615_v4  ;;  %143 = vmatpush.msra.mxu0 %v114_v9  ;;  %v165_v61 = vld [vmem:[%s912_s3] sm:$0xff]  ;;  %v232_v16 = vld [vmem:[%s913_s4 + $0x10] sm:$0xff] }
  0x11   :  { %553 = vset.pattern.permute.xlu0 %v615_v4  ;;  %81 = vperm.xlu1 %555, %v47_v1   ;;  %v118_v62 = vld [vmem:[%s916_s7 + $0x1] ss:$0 sm:$0xff]  ;;  %v323_v24 = vld [vmem:[#allocation2 + $0xf0] sm:$0xff] }
  0x12   :  { %77 = vperm.xlu0 %553, %v46_v2   ;;  %557 = vset.pattern.permute.xlu2 %v615_v4  ;;  %v355_v25 = vld [vmem:[#allocation2 + $0x1f0] sm:$0xff] }
  0x13   :  { %85 = vperm.xlu2 %557, %v48_v3   ;;  %144 = vmatpush.msra.mxu0 %v113_v10 }
  0x14   :  { %185 = vmatpush.msra.mxu1 %v177_v32  ;;  %v354_v32 = vld [vmem:[#allocation2 + $0x1e8] sm:$0xff] }
  0x15   :  { %145 = vmatpush.msra.mxu0 %v112_v11 }
  0x16   :  { %186 = vmatpush.msra.mxu1 %v176_v36  ;;  %v352_v36 = vld [vmem:[#allocation2 + $0x1d8] sm:$0xff] }
  0x17   :  { %146 = vmatpush.msra.mxu0 %v111_v12  ;;  %v236_v12 = vld [vmem:[%s913_s4 + $0x30] sm:$0xff] }
  0x18   :  { %187 = vmatpush.msra.mxu1 %v175_v37  ;;  %263 = vmatpush.msra.mxu2 %v236_v12  ;;  %v338_v12 = vld [vmem:[#allocation2 + $0x168] sm:$0xff] }
  0x19   :  { %558 = vset.pattern.permute.xlu1 %v614_v0  ;;  %147 = vmatpush.msra.mxu0 %v110_v13  ;;  %v237_v13 = vld [vmem:[%s913_s4 + $0x38] sm:$0xff] }
  0x1a   :  { %68 = vperm.xlu1 %558, %v49_v5   ;;  %188 = vmatpush.msra.mxu1 %v174_v41 }
  0x1b   :  { %89 = vperm.xlu2 %557, %v49_v5   ;;  %283 = vmatpush.msra.mxu3 %v237_v13  ;;  %v303_v13 = vld [vmem:[#allocation2 + $0x50] sm:$0xff] }
  0x1c   :  { %189 = vmatpush.msra.mxu1 %v173_v42  ;;  %v318_v42 = vld [vmem:[#allocation2 + $0xc8] sm:$0xff] }
  0x1e   :  { %190 = vmatpush.msra.mxu1 %v172_v45  ;;  %v347_v45 = vld [vmem:[#allocation2 + $0x1b0] sm:$0xff] }
  0x20   :  { %191 = vmatpush.msra.mxu1 %v171_v48  ;;  %v313_v48 = vld [vmem:[#allocation2 + $0xa0] sm:$0xff] }
  0x22   :  { %192 = vmatpush.msra.mxu1 %v170_v52  ;;  %v346_v52 = vld [vmem:[#allocation2 + $0x1a8] sm:$0xff] }
  0x24   :  { %193 = vmatpush.msra.mxu1 %v169_v53  ;;  %v311_v53 = vld [vmem:[#allocation2 + $0x90] sm:$0xff] }
  0x26   :  { %194 = vmatpush.msra.mxu1 %v168_v56  ;;  %v344_v56 = vld [vmem:[#allocation2 + $0x198] sm:$0xff] }
  0x28   :  { %195 = vmatpush.msra.mxu1 %v167_v59  ;;  %v341_v59 = vld [vmem:[#allocation2 + $0x180] sm:$0xff] }
  0x2a   :  { %196 = vmatpush.msra.mxu1 %v166_v60 }
  0x2c   :  { %197 = vmatpush.msra.mxu1 %v165_v61 }
  0x63   :  { %v64_v17 = vpop.permute.xlu2 %63 }
  0x64   :  { %v74_v38 = vmul.f32 %v71_v18, %v64_v17  ;;  %v233_v17 = vld [vmem:[%s913_s4 + $0x18] sm:$0xff] }
  0x6d   :  { %v86_v33 = vpop.permute.xlu2 %85 }
  0x6e   :  { %v95_v39 = vmul.f32 %v92_v19, %v86_v33  ;;  %v319_v33 = vld [vmem:[#allocation2 + $0xd0] sm:$0xff] }
  0x70   :  { %v99_v43 = vadd.f32 %v95_v39, %v74_v38  ;;  %v317_v38 = vld [vmem:[#allocation2 + $0xc0] sm:$0xff] }
  0x71   :  { %v349_v39 = vld [vmem:[#allocation2 + $0x1c0] sm:$0xff] }
  0x72   :  { %v104_v51 = vadd.f32 %v101_v26, %v99_v43  ;;  %v350_v43 = vld [vmem:[#allocation2 + $0x1c8] sm:$0xff] }
  0x74   :  { %v108_v55 = vmax.f32 %v104_v51, 0.0  ;;  %v314_v51 = vld [vmem:[#allocation2 + $0xa8] sm:$0xff] }
  0x75   :  { %v90_v46 = vpop.permute.xlu2 %89 }
  0x76   :  { %v96_v49 = vmul.f32 %v92_v19, %v90_v46  ;;  %v316_v46 = vld [vmem:[#allocation2 + $0xb8] sm:$0xff] }
  0x7a   :  { %v59_v15 = vpop.permute.xlu1 %58 }
  0x7b   :  { %v54_v14 = vpop.permute.xlu0 %53  ;;  %v73_v27 = vmul.f32 %v71_v18, %v59_v15  ;;  %v235_v15 = vld [vmem:[%s913_s4 + $0x28] sm:$0xff] }
  0x7c   :  { %v72_v22 = vmul.f32 %v71_v18, %v54_v14  ;;  %v234_v14 = vld [vmem:[%s913_s4 + $0x20] sm:$0xff]  ;;  %284 = vmatpush.msra.mxu3 %v235_v15 }
  0x7d   :  { %264 = vmatpush.msra.mxu2 %v234_v14  ;;  %v335_v14 = vld [vmem:[#allocation2 + $0x150] sm:$0xff] }
  0x7e   :  { %285 = vmatpush.msra.mxu3 %v233_v17  ;;  %v336_v17 = vld [vmem:[#allocation2 + $0x158] sm:$0xff] }
  0x7f   :  { %265 = vmatpush.msra.mxu2 %v232_v16  ;;  %v304_v16 = vld [vmem:[#allocation2 + $0x58] sm:$0xff] }
  0x83   :  { %v82_v20 = vpop.permute.xlu1 %81 }
  0x84   :  { %v78_v21 = vpop.permute.xlu0 %77  ;;  %v94_v28 = vmul.f32 %v92_v19, %v82_v20  ;;  %v789_v20 = vld [vmem:[%s916_s7 + $0x2] ss:$0 sm:$0xff] }
  0x85   :  { %v93_v23 = vmul.f32 %v92_v19, %v78_v21  ;;  %v231_v19 = vld [vmem:[%s913_s4 + $0x8] sm:$0xff] }
  0x86   :  { %v98_v34 = vadd.f32 %v94_v28, %v73_v27  ;;  %286 = vmatpush.msra.mxu3 %v231_v19  ;;  %v356_v27 = vld [vmem:[#allocation2 + $0x1f8] sm:$0xff]  ;;  %v321_v28 = vld [vmem:[#allocation2 + $0xe0] sm:$0xff] }
  0x87   :  { %v97_v29 = vadd.f32 %v93_v23, %v72_v22  ;;  %424 = vmatpush.msrb.mxu1 %v356_v27  ;;  %v333_v19 = vld [vmem:[#allocation2 + $0x140] sm:$0xff]  ;;  %v300_v27 = vld [vmem:[#allocation2 + $0x38] sm:$0xff] }
  0x88   :  { %v103_v40 = vadd.f32 %v101_v26, %v98_v34  ;;  %384 = vmatpush.msrb.mxu3 %v355_v25  ;;  %v351_v34 = vld [vmem:[#allocation2 + $0x1d0] sm:$0xff] }
  0x89   :  { %v102_v31 = vadd.f32 %v101_v26, %v97_v29  ;;  %v353_v29 = vld [vmem:[#allocation2 + $0x1e0] sm:$0xff]  ;;  %425 = vmatpush.msrb.mxu1 %v354_v32  ;;  %v331_v25 = vld [vmem:[#allocation2 + $0x130] sm:$0xff] }
  0x8a   :  { %v107_v44 = vmax.f32 %v103_v40, 0.0  ;;  %385 = vmatpush.msrb.mxu3 %v353_v29 }
  0x8b   :  { %v106_v35 = vmax.f32 %v102_v31, 0.0  ;;  %v322_v31 = vld [vmem:[#allocation2 + $0xe8] sm:$0xff]  ;;  %426 = vmatpush.msrb.mxu1 %v352_v36  ;;  %v329_v36 = vld [vmem:[#allocation2 + $0x120] sm:$0xff] }
  0x8c   :  { %v69_v47 = vpop.permute.xlu1 %68  ;;  %386 = vmatpush.msrb.mxu3 %v351_v34 }
  0x8d   :  { %538 = vmatmul.msk.f32.vlgmr.msra.gmra.mxu0 %vm119_vm0, %v106_v35  ;;  %v75_v50 = vmul.f32 %v71_v18, %v69_v47  ;;  %v230_v18 = vld [vmem:[%s913_s4] sm:$0xff]  ;;  %v320_v35 = vld [vmem:[#allocation2 + $0xd8] sm:$0xff]  ;;  %427 = vmatpush.msrb.mxu1 %v350_v43 }
  0x8e   :  { %266 = vmatpush.msra.mxu2 %v230_v18  ;;  %387 = vmatpush.msrb.mxu3 %v349_v39  ;;  %v348_v47 = vld [vmem:[#allocation2 + $0x1b8] sm:$0xff]  ;;  %v301_v18 = vld [vmem:[#allocation2 + $0x40] sm:$0xff]  ;;  %v295_v39 = vld [vmem:[#allocation2 + $0x10] sm:$0xff] }
  0x8f   :  { %v100_v54 = vadd.f32 %v96_v49, %v75_v50  ;;  %v345_v49 = vld [vmem:[#allocation2 + $0x1a0] sm:$0xff]  ;;  %428 = vmatpush.msrb.mxu1 %v348_v47  ;;  %v477_v47 = vld [vmem:[%s915_s6 + $0xf8] sm:$0xff] }
  0x90   :  { %364 = vmatpush.msrb.mxu2 %v323_v24  ;;  %388 = vmatpush.msrb.mxu3 %v347_v45  ;;  %v299_v24 = vld [vmem:[#allocation2 + $0x30] sm:$0xff]  ;;  %v293_v43 = vld [vmem:[#allocation2] sm:$0xff]  ;;  %v294_v45 = vld [vmem:[#allocation2 + $0x8] sm:$0xff] }
  0x91   :  { %v105_v57 = vadd.f32 %v101_v26, %v100_v54  ;;  %v324_v26 = vld [vmem:[#allocation2 + $0xf8] sm:$0xff]  ;;  %v343_v54 = vld [vmem:[#allocation2 + $0x190] sm:$0xff]  ;;  %429 = vmatpush.msrb.mxu1 %v346_v52  ;;  %v459_v52 = vld [vmem:[%s915_s6 + $0x68] sm:$0xff] }
  0x92   :  { %404 = vmatpush.msrb.mxu0 %v324_v26  ;;  %365 = vmatpush.msrb.mxu2 %v321_v28  ;;  %v332_v28 = vld [vmem:[#allocation2 + $0x138] sm:$0xff] }
  0x93   :  { %v109_v58 = vmax.f32 %v105_v57, 0.0  ;;  %389 = vmatpush.msrb.mxu3 %v345_v49  ;;  %430 = vmatpush.msrb.mxu1 %v344_v56  ;;  %v461_v49 = vld [vmem:[%s915_s6 + $0x78] sm:$0xff] }
  0x94   :  { %405 = vmatpush.msrb.mxu0 %v322_v31  ;;  %366 = vmatpush.msrb.mxu2 %v319_v33  ;;  %v457_v56 = vld [vmem:[%s915_s6 + $0x58] sm:$0xff] }
  0x95   :  { %539 = vmatmul.msk.f32.gmra.mxu0 %vm119_vm0, %v107_v44  ;;  %v315_v44 = vld [vmem:[#allocation2 + $0xb0] sm:$0xff]  ;;  %390 = vmatpush.msrb.mxu3 %v343_v54  ;;  %v458_v54 = vld [vmem:[%s915_s6 + $0x60] sm:$0xff] }
  0x96   :  { %406 = vmatpush.msrb.mxu0 %v320_v35  ;;  %367 = vmatpush.msrb.mxu2 %v317_v38  ;;  %v297_v35 = vld [vmem:[#allocation2 + $0x20] sm:$0xff]  ;;  %v330_v38 = vld [vmem:[#allocation2 + $0x128] sm:$0xff] }
  0x97   :  { %391 = vmatpush.msrb.mxu3 %v341_v59  ;;  %v471_v59 = vld [vmem:[%s915_s6 + $0xc8] sm:$0xff] }
  0x98   :  { %407 = vmatpush.msrb.mxu0 %v318_v42  ;;  %368 = vmatpush.msrb.mxu2 %v315_v44  ;;  %v328_v42 = vld [vmem:[#allocation2 + $0x118] sm:$0xff]  ;;  %v325_v44 = vld [vmem:[#allocation2 + $0x100] sm:$0xff] }
  0x9a   :  { %408 = vmatpush.msrb.mxu0 %v316_v46  ;;  %369 = vmatpush.msrb.mxu2 %v313_v48  ;;  %v326_v46 = vld [vmem:[#allocation2 + $0x108] sm:$0xff]  ;;  %v476_v48 = vld [vmem:[%s915_s6 + $0xf0] sm:$0xff] }
  0x9c   :  { %409 = vmatpush.msrb.mxu0 %v314_v51  ;;  %370 = vmatpush.msrb.mxu2 %v311_v53  ;;  %v475_v51 = vld [vmem:[%s915_s6 + $0xe8] sm:$0xff]  ;;  %v474_v53 = vld [vmem:[%s915_s6 + $0xe0] sm:$0xff] }
  0x9d   :  { %540 = vmatmul.msk.f32.gmra.mxu0 %vm119_vm0, %v108_v55  ;;  %v312_v55 = vld [vmem:[#allocation2 + $0x98] sm:$0xff] }
  0x9e   :  { %410 = vmatpush.msrb.mxu0 %v312_v55  ;;  %v473_v55 = vld [vmem:[%s915_s6 + $0xd8] sm:$0xff] }
  0xa5   :  { %541 = vmatmul.msk.f32.gmra.mxu0 %vm119_vm0, %v109_v58  ;;  %v309_v58 = vld [vmem:[#allocation2 + $0x80] sm:$0xff] }
  0xa6   :  { %371 = vmatpush.msrb.mxu2 %v309_v58  ;;  %v456_v58 = vld [vmem:[%s915_s6 + $0x50] sm:$0xff] }
 0x10a   :  { %v149_v63 = vpop.f32.mrf.mxu0 }
 0x10b   :  { %v150_v0 = vadd.f32 %v149_v63, %v118_v62  ;;  %v342_v63 = vld [vmem:[#allocation2 + $0x188] sm:$0xff] }
 0x10c   :  { %431 = vmatpush.msrb.mxu1 %v342_v63  ;;  %v469_v63 = vld [vmem:[%s915_s6 + $0xb8] sm:$0xff] }
 0x10d   :  { %v161_v1 = vmax.f32 %v150_v0, 0.0 }
 0x10f   :  { %198 = vmatmul.f32.vlgmr.msra.gmra.mxu1 %v161_v1  ;;  %v307_v1 = vld [vmem:[#allocation2 + $0x70] sm:$0xff] }
 0x110   :  { %372 = vmatpush.msrb.mxu2 %v307_v1  ;;  %v468_v1 = vld [vmem:[%s915_s6 + $0xb0] sm:$0xff] }
 0x112   :  { %v152_v2 = vpop.f32.mrf.mxu0 }
 0x113   :  { %v153_v3 = vadd.f32 %v152_v2, %v118_v62  ;;  %v339_v2 = vld [vmem:[#allocation2 + $0x170] sm:$0xff] }
 0x114   :  { %392 = vmatpush.msrb.mxu3 %v339_v2  ;;  %v467_v2 = vld [vmem:[%s915_s6 + $0xa8] sm:$0xff] }
 0x115   :  { %v162_v4 = vmax.f32 %v153_v3, 0.0  ;;  %v308_v3 = vld [vmem:[#allocation2 + $0x78] sm:$0xff] }
 0x117   :  { %201 = vmatmul.f32.gmra.mxu1 %v162_v4  ;;  %v340_v4 = vld [vmem:[#allocation2 + $0x178] sm:$0xff] }
 0x118   :  { %432 = vmatpush.msrb.mxu1 %v340_v4  ;;  %v466_v4 = vld [vmem:[%s915_s6 + $0xa0] sm:$0xff] }
 0x11a   :  { %v155_v5 = vpop.f32.mrf.mxu0  ;;  %433 = vmatpush.msrb.mxu1 %v338_v12 }
 0x11b   :  { %v156_v6 = vadd.f32 %v155_v5, %v118_v62 }
 0x11c   :  { %434 = vmatpush.msrb.mxu1 %v336_v17  ;;  %v450_v17 = vld [vmem:[%s915_s6 + $0x20] sm:$0xff] }
 0x11d   :  { %v163_v7 = vmax.f32 %v156_v6, 0.0 }
 0x11f   :  { %204 = vmatmul.f32.gmra.mxu1 %v163_v7  ;;  %v305_v7 = vld [vmem:[#allocation2 + $0x60] sm:$0xff] }
 0x120   :  { %373 = vmatpush.msrb.mxu2 %v305_v7 }
 0x122   :  { %v158_v8 = vpop.f32.mrf.mxu0  ;;  %374 = vmatpush.msrb.mxu2 %v303_v13  ;;  %v452_v13 = vld [vmem:[%s915_s6 + $0x30] sm:$0xff] }
 0x123   :  { %v159_v9 = vadd.f32 %v158_v8, %v118_v62  ;;  %v310_v62 = vld [vmem:[#allocation2 + $0x88] sm:$0xff]  ;;  %v337_v8 = vld [vmem:[#allocation2 + $0x160] sm:$0xff] }
 0x124   :  { %411 = vmatpush.msrb.mxu0 %v310_v62  ;;  %393 = vmatpush.msrb.mxu3 %v337_v8  ;;  %v454_v62 = vld [vmem:[%s915_s6 + $0x40] sm:$0xff] }
 0x125   :  { %v164_v10 = vmax.f32 %v159_v9, 0.0  ;;  %375 = vmatpush.msrb.mxu2 %v301_v18  ;;  %v463_v18 = vld [vmem:[%s915_s6 + $0x88] sm:$0xff] }
 0x126   :  { %412 = vmatpush.msrb.mxu0 %v308_v3  ;;  %394 = vmatpush.msrb.mxu3 %v335_v14  ;;  %v542_v3 = vld [vmem:[%s916_s7 + $0x3] ss:$8 sm:$0x3]  ;;  %v465_v14 = vld [vmem:[%s915_s6 + $0x98] sm:$0xff] }
 0x127   :  { %207 = vmatmul.f32.gmra.mxu1 %v164_v10  ;;  %376 = vmatpush.msrb.mxu2 %v299_v24  ;;  %v545_v24 = vld [vmem:[%s916_s7 + $0x4] ss:$8 sm:$0x3] }
 0x128   :  { %395 = vmatpush.msrb.mxu3 %v333_v19  ;;  %v449_v19 = vld [vmem:[%s915_s6 + $0x18] sm:$0xff] }
 0x129   :  { %377 = vmatpush.msrb.mxu2 %v297_v35 }
 0x12a   :  { %396 = vmatpush.msrb.mxu3 %v331_v25  ;;  %v361_v25 = vperm.slane %v545_v24, 1 }
 0x12b   :  { %378 = vmatpush.msrb.mxu2 %v295_v39 }
 0x12c   :  { %397 = vmatpush.msrb.mxu3 %v329_v36 }
 0x12d   :  { %379 = vmatpush.msrb.mxu2 %v293_v43 }
 0x18c   :  { %v199_v11 = vpop.f32.mrf.mxu1 }
 0x18d   :  { %v200_v23 = vadd.f32 %v199_v11, %v789_v20  ;;  %v306_v11 = vld [vmem:[#allocation2 + $0x68] sm:$0xff] }
 0x18e   :  { %413 = vmatpush.msrb.mxu0 %v306_v11 }
 0x18f   :  { %v212_v37 = vsel %vm211_vm1, %v200_v23, -inf  ;;  %v334_v23 = vld [vmem:[#allocation2 + $0x148] sm:$0xff] }
 0x190   :  { %414 = vmatpush.msrb.mxu0 %v304_v16  ;;  %435 = vmatpush.msrb.mxu1 %v334_v23  ;;  %v464_v16 = vld [vmem:[%s915_s6 + $0x90] sm:$0xff]  ;;  %v446_v23 = vld [vmem:[%s915_s6] sm:$0xff] }
 0x192   :  { %436 = vmatpush.msrb.mxu1 %v332_v28 }
 0x194   :  { %v202_v21 = vpop.f32.mrf.mxu1  ;;  %437 = vmatpush.msrb.mxu1 %v330_v38 }
 0x195   :  { %v203_v22 = vadd.f32 %v202_v21, %v789_v20 }
 0x196   :  { %438 = vmatpush.msrb.mxu1 %v328_v42 }
 0x197   :  { %v213_v30 = vsel %vm211_vm1, %v203_v22, -inf  ;;  %v302_v22 = vld [vmem:[#allocation2 + $0x48] sm:$0xff] }
 0x198   :  { %v214_v40 = vmax.f32 %v212_v37, %v213_v30  ;;  %415 = vmatpush.msrb.mxu0 %v302_v22  ;;  %v298_v37 = vld [vmem:[#allocation2 + $0x28] sm:$0xff]  ;;  %439 = vmatpush.msrb.mxu1 %v326_v46 }
 0x199   :  { %v447_v22 = vld [vmem:[%s915_s6 + $0x8] sm:$0xff] }
 0x19a   :  { %v215_v50 = vrot.slane %v214_v40, 4  ;;  %416 = vmatpush.msrb.mxu0 %v300_v27 }
 0x19c   :  { %v205_v41 = vpop.f32.mrf.mxu1  ;;  %v216_v60 = vmax.f32 %v214_v40, %v215_v50  ;;  %417 = vmatpush.msrb.mxu0 %v298_v37  ;;  %v327_v40 = vld [vmem:[#allocation2 + $0x110] sm:$0xff]  ;;  %v478_v37 = vld [vmem:[%s916_s7 + $0x5] ss:$0 sm:$0xff] }
 0x19d   :  { %v206_v57 = vadd.f32 %v205_v41, %v789_v20  ;;  %v296_v41 = vld [vmem:[#allocation2 + $0x18] sm:$0xff]  ;;  %398 = vmatpush.msrb.mxu3 %v327_v40  ;;  %v460_v50 = vld [vmem:[%s915_s6 + $0x70] sm:$0xff] }
 0x19e   :  { %v217_v9 = vrot.slane %v216_v60, 2  ;;  %418 = vmatpush.msrb.mxu0 %v296_v41 }
 0x19f   :  { %v221_v5 = vsel %vm211_vm1, %v206_v57, -inf  ;;  %399 = vmatpush.msrb.mxu3 %v325_v44  ;;  %v472_v57 = vld [vmem:[%s915_s6 + $0xd0] sm:$0xff] }
 0x1a0   :  { %419 = vmatpush.msrb.mxu0 %v294_v45 }
 0x1a4   :  { %v208_v61 = vpop.f32.mrf.mxu1 }
 0x1a5   :  { %v209_v0 = vadd.f32 %v208_v61, %v789_v20  ;;  %v218_v20 = vmax.f32 %v216_v60, %v217_v9  ;;  %v455_v60 = vld [vmem:[%s915_s6 + $0x48] sm:$0xff]  ;;  %v470_v61 = vld [vmem:[%s915_s6 + $0xc0] sm:$0xff] }
 0x1a7   :  { %v222_v6 = vsel %vm211_vm1, %v209_v0, -inf  ;;  %v219_v30 = vrot.slane %v218_v20, 1  ;;  %v453_v0 = vld [vmem:[%s915_s6 + $0x38] sm:$0xff] }
 0x1a8   :  { %v223_v10 = vmax.f32 %v221_v5, %v222_v6  ;;  %v241_v5 = vperm.slane %v542_v3, 0  ;;  %v242_v6 = vperm.slane %v542_v3, 1 }
 0x1a9   :  { %v220_v32 = vmax.f32 %v218_v20, %v219_v30  ;;  %v462_v20 = vld [vmem:[%s915_s6 + $0x80] sm:$0xff] }
 0x1aa   :  { %v224_v15 = vrot.slane %v223_v10, 4 }
 0x1ac   :  { %v225_v21 = vmax.f32 %v223_v10, %v224_v15  ;;  %v451_v15 = vld [vmem:[%s915_s6 + $0x28] sm:$0xff] }
 0x1ae   :  { %v226_v26 = vrot.slane %v225_v21, 2 }
 0x1b0   :  { %v227_v29 = vmax.f32 %v225_v21, %v226_v26  ;;  %v448_v21 = vld [vmem:[%s915_s6 + $0x10] sm:$0xff] }
 0x1b2   :  { %v228_v31 = vrot.slane %v227_v29, 1 }
 0x1b4   :  { %v229_v33 = vmax.f32 %v227_v29, %v228_v31  ;;  %v360_v29 = vperm.slane %v545_v24, 0 }
 0x1b6   :  { %v248_v34 = vsel %vm247_vm2, %v229_v33, %v220_v32 }
 0x1b7   :  { %543 = vmatmul.msk.f32.vlgmr.msra.gmra.mxu2 %vm211_vm1, %v248_v34  ;;  %544 = vmatmul.msk.f32.vlgmr.msra.gmra.mxu3 %vm211_vm1, %v248_v34 }
 0x1b8   :  { %499 = vmatpush.msra.mxu3 %v477_v47  ;;  %479 = vmatpush.msra.mxu2 %v461_v49 }
 0x1ba   :  { %500 = vmatpush.msra.mxu3 %v476_v48  ;;  %480 = vmatpush.msra.mxu2 %v460_v50 }
 0x1bc   :  { %501 = vmatpush.msra.mxu3 %v475_v51  ;;  %481 = vmatpush.msra.mxu2 %v459_v52 }
 0x1be   :  { %502 = vmatpush.msra.mxu3 %v474_v53  ;;  %482 = vmatpush.msra.mxu2 %v458_v54 }
 0x1c0   :  { %503 = vmatpush.msra.mxu3 %v473_v55  ;;  %483 = vmatpush.msra.mxu2 %v457_v56 }
 0x1c2   :  { %504 = vmatpush.msra.mxu3 %v472_v57  ;;  %484 = vmatpush.msra.mxu2 %v456_v58 }
 0x1c4   :  { %505 = vmatpush.msra.mxu3 %v471_v59  ;;  %485 = vmatpush.msra.mxu2 %v455_v60 }
 0x1c6   :  { %506 = vmatpush.msra.mxu3 %v470_v61  ;;  %486 = vmatpush.msra.mxu2 %v454_v62 }
 0x1c8   :  { %507 = vmatpush.msra.mxu3 %v469_v63  ;;  %487 = vmatpush.msra.mxu2 %v453_v0 }
 0x1ca   :  { %508 = vmatpush.msra.mxu3 %v468_v1  ;;  %488 = vmatpush.msra.mxu2 %v452_v13 }
 0x1cc   :  { %509 = vmatpush.msra.mxu3 %v467_v2  ;;  %489 = vmatpush.msra.mxu2 %v451_v15 }
 0x1ce   :  { %510 = vmatpush.msra.mxu3 %v466_v4  ;;  %490 = vmatpush.msra.mxu2 %v450_v17 }
 0x1d0   :  { %511 = vmatpush.msra.mxu3 %v465_v14  ;;  %491 = vmatpush.msra.mxu2 %v449_v19 }
 0x1d2   :  { %512 = vmatpush.msra.mxu3 %v464_v16  ;;  %492 = vmatpush.msra.mxu2 %v448_v21 }
 0x1d4   :  { %513 = vmatpush.msra.mxu3 %v463_v18  ;;  %493 = vmatpush.msra.mxu2 %v447_v22 }
 0x1d6   :  { %514 = vmatpush.msra.mxu3 %v462_v20  ;;  %494 = vmatpush.msra.mxu2 %v446_v23 }
 0x23a   :  { %v268_v7 = vpop.f32.mrf.mxu2  ;;  %v288_v8 = vpop.f32.mrf.mxu3 }
 0x23b   :  { %v269_v9 = vadd.f32 %v268_v7, %v241_v5  ;;  %v289_v10 = vadd.f32 %v288_v8, %v242_v6 }
 0x23d   :  { %v291_v11 = vmax.f32 %v269_v9, 0.0  ;;  %v292_v12 = vmax.f32 %v289_v10, 0.0 }
 0x23f   :  { %380 = vmatmul.f32.vlgmr.msrb.gmra.mxu2 %v291_v11  ;;  %400 = vmatmul.f32.vlgmr.msrb.gmra.mxu3 %v292_v12 }
 0x240   :  { %420 = vmatmul.f32.vlgmr.msrb.gmra.mxu0 %v291_v11  ;;  %440 = vmatmul.f32.vlgmr.msrb.gmra.mxu1 %v292_v12 }
 0x2bd   :  { %v421_v26 = vpop.f32.mrf.mxu0  ;;  %v441_v28 = vpop.f32.mrf.mxu1 }
 0x2be   :  { %v422_v27 = vadd.f32 %v421_v26, %v361_v25 }
 0x2c0   :  { %v442_v30 = vadd.f32 %v441_v28, %v422_v27 }
 0x2c2   :  { %v445_v31 = vmax.f32 %v442_v30, 0.0  ;;  %v381_v32 = vpop.f32.mrf.mxu2  ;;  %v401_v34 = vpop.f32.mrf.mxu3 }
 0x2c3   :  { %v382_v33 = vadd.f32 %v381_v32, %v360_v29 }
 0x2c4   :  { %515 = vmatmul.f32.vlgmr.msra.gmra.mxu3 %v445_v31 }
 0x2c5   :  { %v402_v35 = vadd.f32 %v401_v34, %v382_v33 }
 0x2c7   :  { %v444_v36 = vmax.f32 %v402_v35, 0.0 }
 0x2c9   :  { %495 = vmatmul.f32.vlgmr.msra.gmra.mxu2 %v444_v36 }
 0x347   :  { %v516_v40 = vpop.f32.mrf.mxu3 }
 0x34c   :  { %v496_v38 = vpop.f32.mrf.mxu2 }
 0x34d   :  { %v497_v39 = vadd.f32 %v496_v38, %v478_v37 }
 0x34f   :  { %v517_v41 = vadd.f32 %v516_v40, %v497_v39 }
 0x351   :  { %520 = vst.msk [vmem:[#allocation5] sm:$0x3] %vm519_vm3, %v517_v41 }
 0x352   :  { %531 = dma.vmem_to_hbm [thread:$0]  %s527_s24, 32, %s529_s0, [#allocation4]  }
 0x353   :  { %609 = dma.done.wait [#allocation4], 32  }
 0x354   :  { %610 = vsyncadd [#allocation4], 4294967264 }
 0x355   :  { %536 = vsyncpa [#allocation3], 1 }
 0x356   :  { %537 = vsyncpa [#allocation4], 1 }

</bundles_post_ra>
